<compile_context>
chip_gen: v7x
topology: tpu7x:2x2x1
jax: 0.10.0
libtpu: 0.0.40
codegen_flags: <defaults>
</compile_context>

<pallas_src>
import jax
import jax.numpy as jnp
from jax.experimental import pallas as pl
from jax.experimental.pallas import tpu as pltpu


def lstm_fc_kernel(x_ref, wih_ref, whh_ref, b_ref, wfc_ref, bfc_ref, out_ref):
    """Full LSTM recurrence + last-step FC + sigmoid in one invocation.

    x_ref:   (B, T, D)   raw input, batch_first (same as the PyTorch module)
    wih_ref: (D, 4H)     W_ih^T
    whh_ref: (H, 4H)     W_hh^T
    b_ref:   (1, 4H)     b_ih + b_hh (folded once at prepare time)
    wfc_ref: (H, Op)     W_fc^T, lane-padded to Op = ceil(O/128)*128
    bfc_ref: (1, Op)     b_fc, lane-padded
    out_ref: (B, O)      sigmoid(fc(h_T))  (true output width, no wrapper slice)
    """
    B, T, D = x_ref.shape
    H, H4 = whh_ref.shape
    O = out_ref.shape[1]

    # Hoisted single loads (ref reads are not CSE'd across the unrolled loop).
    wih = wih_ref[...]            # (D, 4H)
    whh = whh_ref[...]            # (H, 4H)
    bias = b_ref[...]             # (1, 4H)

    # Fused input projection for ALL timesteps: one small MXU pass.
    # Row b*T + t of gx2 holds gates_x for (batch b, time t).
    x2 = x_ref[...].reshape(B * T, D)                                  # (B*T, D)
    gx2 = jnp.dot(x2, wih, preferred_element_type=jnp.float32) + bias  # (B*T, 4H)
    gx = gx2.reshape(B, T, H4)                                         # (B, T, 4H)

    h = jnp.zeros((B, H), jnp.float32)
    c = jnp.zeros((B, H), jnp.float32)

    # T is small and static: fully unrolled serial recurrence.
    for t in range(T):
        gates = gx[:, t, :]                                   # (B, 4H)
        if t > 0:  # h == 0 at t == 0, so the recurrent matmul can be skipped
            gates = gates + jnp.dot(h, whh,
                                    preferred_element_type=jnp.float32)
        # Activate the whole tile once, then take lane slices (PyTorch gate
        # order: input, forget, cell (g), output).
        sg = jax.nn.sigmoid(gates)                            # (B, 4H)
        tg = jnp.tanh(gates)                                  # (B, 4H)
        i_g = sg[:, 0 * H:1 * H]
        f_g = sg[:, 1 * H:2 * H]
        g_g = tg[:, 2 * H:3 * H]
        o_g = sg[:, 3 * H:4 * H]
        c = f_g * c + i_g * g_g
        h = o_g * jnp.tanh(c)

    # Final FC (lane-dense padded weights) + sigmoid; store true O lanes.
    wfc = wfc_ref[...]            # (H, Op)
    bfc = bfc_ref[...]            # (1, Op)
    logits = jnp.dot(h, wfc, preferred_element_type=jnp.float32) + bfc
    out_ref[...] = jax.nn.sigmoid(logits[:, :O])


def prepare_params(w_ih, w_hh, b_ih, b_hh, w_fc, b_fc):
    """Call-invariant weight prep. Run ONCE (outside the per-call hot path)."""
    H4, D = w_ih.shape
    O, H = w_fc.shape
    Op = ((O + 127) // 128) * 128

    wih_t = jnp.asarray(w_ih.T, jnp.float32)                       # (D, 4H)
    whh_t = jnp.asarray(w_hh.T, jnp.float32)                       # (H, 4H)
    bias = jnp.asarray((b_ih + b_hh).reshape(1, H4), jnp.float32)  # (1, 4H)
    wfc_p = jnp.zeros((H, Op), jnp.float32).at[:, :O].set(w_fc.T)  # (H, Op)
    bfc_p = jnp.zeros((1, Op), jnp.float32).at[0, :O].set(b_fc)    # (1, Op)
    return wih_t, whh_t, bias, wfc_p, bfc_p


@jax.jit
def candle_lstm_forward(x, wih_t, whh_t, bias, wfc_p, bfc_p):
    """x: (B, T, D) float32 (batch_first, batched path of the PyTorch module)."""
    B, T, D = x.shape
    H = whh_t.shape[0]
    O = wfc_p.shape[1]  # padded; true O recovered below
    O_true = int(bias.shape[1]) // 4  # not O; see out width below
    del O_true  # (kept simple: output width comes from b_fc length at prep time)

    # True output width: number of non-padded FC lanes == original output_dim.
    # We carry it via the wfc padding convention: caller passes it explicitly.
    raise_if_unused = None  # placeholder removed below
    del raise_if_unused

    # v7x guard: no grid -> every operand is VMEM-resident for the whole call.
    # Keep well under v7x's 32 MiB default scoped VMEM (physical 64 MiB, half
    # of v5e/v6e).  If T or B ever grows, re-introduce a time grid with h/c in
    # VMEM scratch ("arbitrary" axis) and a parallel batch axis for the 2nd TC.
    resident_bytes = 4 * (x.size + wih_t.size + whh_t.size + bias.size
                          + wfc_p.size + bfc_p.size)
    assert resident_bytes < 16 * 1024 * 1024, (
        "no-grid design assumes full VMEM residency; add a time grid")

    vmem = pltpu.MemorySpace.VMEM
    return pl.pallas_call(
        lstm_fc_kernel,
        out_shape=jax.ShapeDtypeStruct((B, candle_lstm_forward.output_dim),
                                       jnp.float32),
        # No grid: each operand is a single VMEM-resident block (one DMA each,
        # no double buffering, no per-step block re-description).
        in_specs=[pl.BlockSpec(memory_space=vmem)] * 6,
        out_specs=pl.BlockSpec(memory_space=vmem),
    )(x, wih_t, whh_t, bias, wfc_p, bfc_p)


# True (unpadded) FC output width, set once at setup time (static for the jit).
candle_lstm_forward.output_dim = 1


def reference_forward(x, w_ih, w_hh, b_ih, b_hh, w_fc, b_fc):
    """Pure-JAX reference of the PyTorch CandleLSTM forward (3-D input path)."""
    B, T, D = x.shape
    H = w_hh.shape[1]

    def step(carry, x_t):
        h, c = carry
        gates = x_t @ w_ih.T + h @ w_hh.T + b_ih + b_hh
        i = jax.nn.sigmoid(gates[:, 0:H])
        f = jax.nn.sigmoid(gates[:, H:2 * H])
        g = jnp.tanh(gates[:, 2 * H:3 * H])
        o = jax.nn.sigmoid(gates[:, 3 * H:4 * H])
        c = f * c + i * g
        h = o * jnp.tanh(c)
        return (h, c), None

    h0 = jnp.zeros((B, H), jnp.float32)
    c0 = jnp.zeros((B, H), jnp.float32)
    (h_last, _), _ = jax.lax.scan(step, (h0, c0), jnp.transpose(x, (1, 0, 2)))
    return jax.nn.sigmoid(h_last @ w_fc.T + b_fc)


if __name__ == "__main__":
    B, T = 2, 8
    input_dim, hidden_dim, output_dim = 4, 32, 1

    key = jax.random.PRNGKey(0)
    keys = jax.random.split(key, 7)
    scale = 1.0 / jnp.sqrt(hidden_dim)

    x = jax.random.normal(keys[0], (B, T, input_dim), jnp.float32)
    w_ih = jax.random.uniform(keys[1], (4 * hidden_dim, input_dim),
                              jnp.float32, -scale, scale)
    w_hh = jax.random.uniform(keys[2], (4 * hidden_dim, hidden_dim),
                              jnp.float32, -scale, scale)
    b_ih = jax.random.uniform(keys[3], (4 * hidden_dim,),
                              jnp.float32, -scale, scale)
    b_hh = jax.random.uniform(keys[4], (4 * hidden_dim,),
                              jnp.float32, -scale, scale)
    w_fc = jax.random.uniform(keys[5], (output_dim, hidden_dim),
                              jnp.float32, -scale, scale)
    b_fc = jax.random.uniform(keys[6], (output_dim,),
                              jnp.float32, -scale, scale)

    # One-time prep (outside the jitted hot path).
    candle_lstm_forward.output_dim = output_dim
    params = prepare_params(w_ih, w_hh, b_ih, b_hh, w_fc, b_fc)
    params = jax.block_until_ready(params)

    out = candle_lstm_forward(x, *params)
    out = jax.block_until_ready(out)

    ref = reference_forward(x, w_ih, w_hh, b_ih, b_hh, w_fc, b_fc)
    assert out.shape == (B, output_dim), out.shape
    assert jnp.allclose(out, ref, atol=1e-5, rtol=1e-5), (out, ref)

    # TODO(synk): the PyTorch module also accepts 2-D (unbatched) LSTM input;
    # only the standard batched (B, T, D) path is implemented here.
    print("KERNEL_OK")
</pallas_src>

<mosaic_0001>
module attributes {stable_mosaic.version = 11 : i64} {
  func.func @lstm_fc_kernel(%arg0: memref<2x8x4xf32, #tpu.memory_space<vmem>>, %arg1: memref<4x128xf32, #tpu.memory_space<vmem>>, %arg2: memref<32x128xf32, #tpu.memory_space<vmem>>, %arg3: memref<1x128xf32, #tpu.memory_space<vmem>>, %arg4: memref<32x128xf32, #tpu.memory_space<vmem>>, %arg5: memref<1x128xf32, #tpu.memory_space<vmem>>, %arg6: memref<2x1xf32, #tpu.memory_space<vmem>>) attributes {dimension_semantics = [], scalar_prefetch = 0 : i64, scratch_operands = 0 : i64, tpu.core_type = #tpu.core_type<tc>} {
    %c0 = arith.constant 0 : index
    %c0_0 = arith.constant 0 : index
    %0 = vector.load %arg1[%c0, %c0_0] : memref<4x128xf32, #tpu.memory_space<vmem>>, vector<4x128xf32>
    %c0_1 = arith.constant 0 : index
    %c0_2 = arith.constant 0 : index
    %1 = vector.load %arg2[%c0_1, %c0_2] : memref<32x128xf32, #tpu.memory_space<vmem>>, vector<32x128xf32>
    %c0_3 = arith.constant 0 : index
    %c0_4 = arith.constant 0 : index
    %2 = vector.load %arg3[%c0_3, %c0_4] : memref<1x128xf32, #tpu.memory_space<vmem>>, vector<1x128xf32>
    %c0_5 = arith.constant 0 : index
    %c0_6 = arith.constant 0 : index
    %c0_7 = arith.constant 0 : index
    %3 = vector.load %arg0[%c0_5, %c0_6, %c0_7] : memref<2x8x4xf32, #tpu.memory_space<vmem>>, vector<2x8x4xf32>
    %4 = vector.shape_cast %3 : vector<2x8x4xf32> to vector<16x4xf32>
    %cst = arith.constant dense<0.000000e+00> : vector<16x128xf32>
    %5 = tpu.matmul %4, %0, %cst {dimension_numbers = #tpu.dot_dimension_numbers<[1], [0], [0], [1], [0, 0, 1, 1], [], []>} : vector<16x4xf32>, vector<4x128xf32>, vector<16x128xf32> -> vector<16x128xf32>
    %6 = vector.broadcast %2 : vector<1x128xf32> to vector<16x128xf32>
    %7 = arith.addf %5, %6 : vector<16x128xf32>
    %8 = vector.shape_cast %7 : vector<16x128xf32> to vector<2x8x128xf32>
    %cst_8 = arith.constant 0.000000e+00 : f32
    %9 = vector.broadcast %cst_8 : f32 to vector<2x32xf32>
    %10 = vector.extract_strided_slice %8 {offsets = [0, 0, 0], sizes = [2, 1, 128], strides = [1, 1, 1]} : vector<2x8x128xf32> to vector<2x1x128xf32>
    %11 = vector.shape_cast %10 : vector<2x1x128xf32> to vector<2x128xf32>
    %12 = arith.negf %11 : vector<2x128xf32>
    %13 = math.exp %12 : vector<2x128xf32>
    %cst_9 = arith.constant 1.000000e+00 : f32
    %14 = vector.broadcast %cst_9 : f32 to vector<2x128xf32>
    %15 = arith.addf %14, %13 : vector<2x128xf32>
    %16 = arith.divf %14, %15 : vector<2x128xf32>
    %17 = math.tanh %11 : vector<2x128xf32>
    %18 = vector.extract_strided_slice %16 {offsets = [0, 0], sizes = [2, 32], strides = [1, 1]} : vector<2x128xf32> to vector<2x32xf32>
    %19 = vector.extract_strided_slice %16 {offsets = [0, 32], sizes = [2, 32], strides = [1, 1]} : vector<2x128xf32> to vector<2x32xf32>
    %20 = vector.extract_strided_slice %17 {offsets = [0, 64], sizes = [2, 32], strides = [1, 1]} : vector<2x128xf32> to vector<2x32xf32>
    %21 = vector.extract_strided_slice %16 {offsets = [0, 96], sizes = [2, 32], strides = [1, 1]} : vector<2x128xf32> to vector<2x32xf32>
    %22 = arith.mulf %19, %9 : vector<2x32xf32>
    %23 = arith.mulf %18, %20 : vector<2x32xf32>
    %24 = arith.addf %22, %23 : vector<2x32xf32>
    %25 = math.tanh %24 : vector<2x32xf32>
    %26 = arith.mulf %21, %25 : vector<2x32xf32>
    %27 = vector.extract_strided_slice %8 {offsets = [0, 1, 0], sizes = [2, 1, 128], strides = [1, 1, 1]} : vector<2x8x128xf32> to vector<2x1x128xf32>
    %28 = vector.shape_cast %27 : vector<2x1x128xf32> to vector<2x128xf32>
    %cst_10 = arith.constant dense<0.000000e+00> : vector<2x128xf32>
    %29 = tpu.matmul %26, %1, %cst_10 {dimension_numbers = #tpu.dot_dimension_numbers<[1], [0], [0], [1], [0, 0, 1, 1], [], []>} : vector<2x32xf32>, vector<32x128xf32>, vector<2x128xf32> -> vector<2x128xf32>
    %30 = arith.addf %28, %29 : vector<2x128xf32>
    %31 = arith.negf %30 : vector<2x128xf32>
    %32 = math.exp %31 : vector<2x128xf32>
    %cst_11 = arith.constant 1.000000e+00 : f32
    %33 = vector.broadcast %cst_11 : f32 to vector<2x128xf32>
    %34 = arith.addf %33, %32 : vector<2x128xf32>
    %35 = arith.divf %33, %34 : vector<2x128xf32>
    %36 = math.tanh %30 : vector<2x128xf32>
    %37 = vector.extract_strided_slice %35 {offsets = [0, 0], sizes = [2, 32], strides = [1, 1]} : vector<2x128xf32> to vector<2x32xf32>
    %38 = vector.extract_strided_slice %35 {offsets = [0, 32], sizes = [2, 32], strides = [1, 1]} : vector<2x128xf32> to vector<2x32xf32>
    %39 = vector.extract_strided_slice %36 {offsets = [0, 64], sizes = [2, 32], strides = [1, 1]} : vector<2x128xf32> to vector<2x32xf32>
    %40 = vector.extract_strided_slice %35 {offsets = [0, 96], sizes = [2, 32], strides = [1, 1]} : vector<2x128xf32> to vector<2x32xf32>
    %41 = arith.mulf %38, %24 : vector<2x32xf32>
    %42 = arith.mulf %37, %39 : vector<2x32xf32>
    %43 = arith.addf %41, %42 : vector<2x32xf32>
    %44 = math.tanh %43 : vector<2x32xf32>
    %45 = arith.mulf %40, %44 : vector<2x32xf32>
    %46 = vector.extract_strided_slice %8 {offsets = [0, 2, 0], sizes = [2, 1, 128], strides = [1, 1, 1]} : vector<2x8x128xf32> to vector<2x1x128xf32>
    %47 = vector.shape_cast %46 : vector<2x1x128xf32> to vector<2x128xf32>
    %cst_12 = arith.constant dense<0.000000e+00> : vector<2x128xf32>
    %48 = tpu.matmul %45, %1, %cst_12 {dimension_numbers = #tpu.dot_dimension_numbers<[1], [0], [0], [1], [0, 0, 1, 1], [], []>} : vector<2x32xf32>, vector<32x128xf32>, vector<2x128xf32> -> vector<2x128xf32>
    %49 = arith.addf %47, %48 : vector<2x128xf32>
    %50 = arith.negf %49 : vector<2x128xf32>
    %51 = math.exp %50 : vector<2x128xf32>
    %cst_13 = arith.constant 1.000000e+00 : f32
    %52 = vector.broadcast %cst_13 : f32 to vector<2x128xf32>
    %53 = arith.addf %52, %51 : vector<2x128xf32>
    %54 = arith.divf %52, %53 : vector<2x128xf32>
    %55 = math.tanh %49 : vector<2x128xf32>
    %56 = vector.extract_strided_slice %54 {offsets = [0, 0], sizes = [2, 32], strides = [1, 1]} : vector<2x128xf32> to vector<2x32xf32>
    %57 = vector.extract_strided_slice %54 {offsets = [0, 32], sizes = [2, 32], strides = [1, 1]} : vector<2x128xf32> to vector<2x32xf32>
    %58 = vector.extract_strided_slice %55 {offsets = [0, 64], sizes = [2, 32], strides = [1, 1]} : vector<2x128xf32> to vector<2x32xf32>
    %59 = vector.extract_strided_slice %54 {offsets = [0, 96], sizes = [2, 32], strides = [1, 1]} : vector<2x128xf32> to vector<2x32xf32>
    %60 = arith.mulf %57, %43 : vector<2x32xf32>
    %61 = arith.mulf %56, %58 : vector<2x32xf32>
    %62 = arith.addf %60, %61 : vector<2x32xf32>
    %63 = math.tanh %62 : vector<2x32xf32>
    %64 = arith.mulf %59, %63 : vector<2x32xf32>
    %65 = vector.extract_strided_slice %8 {offsets = [0, 3, 0], sizes = [2, 1, 128], strides = [1, 1, 1]} : vector<2x8x128xf32> to vector<2x1x128xf32>
    %66 = vector.shape_cast %65 : vector<2x1x128xf32> to vector<2x128xf32>
    %cst_14 = arith.constant dense<0.000000e+00> : vector<2x128xf32>
    %67 = tpu.matmul %64, %1, %cst_14 {dimension_numbers = #tpu.dot_dimension_numbers<[1], [0], [0], [1], [0, 0, 1, 1], [], []>} : vector<2x32xf32>, vector<32x128xf32>, vector<2x128xf32> -> vector<2x128xf32>
    %68 = arith.addf %66, %67 : vector<2x128xf32>
    %69 = arith.negf %68 : vector<2x128xf32>
    %70 = math.exp %69 : vector<2x128xf32>
    %cst_15 = arith.constant 1.000000e+00 : f32
    %71 = vector.broadcast %cst_15 : f32 to vector<2x128xf32>
    %72 = arith.addf %71, %70 : vector<2x128xf32>
    %73 = arith.divf %71, %72 : vector<2x128xf32>
    %74 = math.tanh %68 : vector<2x128xf32>
    %75 = vector.extract_strided_slice %73 {offsets = [0, 0], sizes = [2, 32], strides = [1, 1]} : vector<2x128xf32> to vector<2x32xf32>
    %76 = vector.extract_strided_slice %73 {offsets = [0, 32], sizes = [2, 32], strides = [1, 1]} : vector<2x128xf32> to vector<2x32xf32>
    %77 = vector.extract_strided_slice %74 {offsets = [0, 64], sizes = [2, 32], strides = [1, 1]} : vector<2x128xf32> to vector<2x32xf32>
    %78 = vector.extract_strided_slice %73 {offsets = [0, 96], sizes = [2, 32], strides = [1, 1]} : vector<2x128xf32> to vector<2x32xf32>
    %79 = arith.mulf %76, %62 : vector<2x32xf32>
    %80 = arith.mulf %75, %77 : vector<2x32xf32>
    %81 = arith.addf %79, %80 : vector<2x32xf32>
    %82 = math.tanh %81 : vector<2x32xf32>
    %83 = arith.mulf %78, %82 : vector<2x32xf32>
    %84 = vector.extract_strided_slice %8 {offsets = [0, 4, 0], sizes = [2, 1, 128], strides = [1, 1, 1]} : vector<2x8x128xf32> to vector<2x1x128xf32>
    %85 = vector.shape_cast %84 : vector<2x1x128xf32> to vector<2x128xf32>
    %cst_16 = arith.constant dense<0.000000e+00> : vector<2x128xf32>
    %86 = tpu.matmul %83, %1, %cst_16 {dimension_numbers = #tpu.dot_dimension_numbers<[1], [0], [0], [1], [0, 0, 1, 1], [], []>} : vector<2x32xf32>, vector<32x128xf32>, vector<2x128xf32> -> vector<2x128xf32>
    %87 = arith.addf %85, %86 : vector<2x128xf32>
    %88 = arith.negf %87 : vector<2x128xf32>
    %89 = math.exp %88 : vector<2x128xf32>
    %cst_17 = arith.constant 1.000000e+00 : f32
    %90 = vector.broadcast %cst_17 : f32 to vector<2x128xf32>
    %91 = arith.addf %90, %89 : vector<2x128xf32>
    %92 = arith.divf %90, %91 : vector<2x128xf32>
    %93 = math.tanh %87 : vector<2x128xf32>
    %94 = vector.extract_strided_slice %92 {offsets = [0, 0], sizes = [2, 32], strides = [1, 1]} : vector<2x128xf32> to vector<2x32xf32>
    %95 = vector.extract_strided_slice %92 {offsets = [0, 32], sizes = [2, 32], strides = [1, 1]} : vector<2x128xf32> to vector<2x32xf32>
    %96 = vector.extract_strided_slice %93 {offsets = [0, 64], sizes = [2, 32], strides = [1, 1]} : vector<2x128xf32> to vector<2x32xf32>
    %97 = vector.extract_strided_slice %92 {offsets = [0, 96], sizes = [2, 32], strides = [1, 1]} : vector<2x128xf32> to vector<2x32xf32>
    %98 = arith.mulf %95, %81 : vector<2x32xf32>
    %99 = arith.mulf %94, %96 : vector<2x32xf32>
    %100 = arith.addf %98, %99 : vector<2x32xf32>
    %101 = math.tanh %100 : vector<2x32xf32>
    %102 = arith.mulf %97, %101 : vector<2x32xf32>
    %103 = vector.extract_strided_slice %8 {offsets = [0, 5, 0], sizes = [2, 1, 128], strides = [1, 1, 1]} : vector<2x8x128xf32> to vector<2x1x128xf32>
    %104 = vector.shape_cast %103 : vector<2x1x128xf32> to vector<2x128xf32>
    %cst_18 = arith.constant dense<0.000000e+00> : vector<2x128xf32>
    %105 = tpu.matmul %102, %1, %cst_18 {dimension_numbers = #tpu.dot_dimension_numbers<[1], [0], [0], [1], [0, 0, 1, 1], [], []>} : vector<2x32xf32>, vector<32x128xf32>, vector<2x128xf32> -> vector<2x128xf32>
    %106 = arith.addf %104, %105 : vector<2x128xf32>
    %107 = arith.negf %106 : vector<2x128xf32>
    %108 = math.exp %107 : vector<2x128xf32>
    %cst_19 = arith.constant 1.000000e+00 : f32
    %109 = vector.broadcast %cst_19 : f32 to vector<2x128xf32>
    %110 = arith.addf %109, %108 : vector<2x128xf32>
    %111 = arith.divf %109, %110 : vector<2x128xf32>
    %112 = math.tanh %106 : vector<2x128xf32>
    %113 = vector.extract_strided_slice %111 {offsets = [0, 0], sizes = [2, 32], strides = [1, 1]} : vector<2x128xf32> to vector<2x32xf32>
    %114 = vector.extract_strided_slice %111 {offsets = [0, 32], sizes = [2, 32], strides = [1, 1]} : vector<2x128xf32> to vector<2x32xf32>
    %115 = vector.extract_strided_slice %112 {offsets = [0, 64], sizes = [2, 32], strides = [1, 1]} : vector<2x128xf32> to vector<2x32xf32>
    %116 = vector.extract_strided_slice %111 {offsets = [0, 96], sizes = [2, 32], strides = [1, 1]} : vector<2x128xf32> to vector<2x32xf32>
    %117 = arith.mulf %114, %100 : vector<2x32xf32>
    %118 = arith.mulf %113, %115 : vector<2x32xf32>
    %119 = arith.addf %117, %118 : vector<2x32xf32>
    %120 = math.tanh %119 : vector<2x32xf32>
    %121 = arith.mulf %116, %120 : vector<2x32xf32>
    %122 = vector.extract_strided_slice %8 {offsets = [0, 6, 0], sizes = [2, 1, 128], strides = [1, 1, 1]} : vector<2x8x128xf32> to vector<2x1x128xf32>
    %123 = vector.shape_cast %122 : vector<2x1x128xf32> to vector<2x128xf32>
    %cst_20 = arith.constant dense<0.000000e+00> : vector<2x128xf32>
    %124 = tpu.matmul %121, %1, %cst_20 {dimension_numbers = #tpu.dot_dimension_numbers<[1], [0], [0], [1], [0, 0, 1, 1], [], []>} : vector<2x32xf32>, vector<32x128xf32>, vector<2x128xf32> -> vector<2x128xf32>
    %125 = arith.addf %123, %124 : vector<2x128xf32>
    %126 = arith.negf %125 : vector<2x128xf32>
    %127 = math.exp %126 : vector<2x128xf32>
    %cst_21 = arith.constant 1.000000e+00 : f32
    %128 = vector.broadcast %cst_21 : f32 to vector<2x128xf32>
    %129 = arith.addf %128, %127 : vector<2x128xf32>
    %130 = arith.divf %128, %129 : vector<2x128xf32>
    %131 = math.tanh %125 : vector<2x128xf32>
    %132 = vector.extract_strided_slice %130 {offsets = [0, 0], sizes = [2, 32], strides = [1, 1]} : vector<2x128xf32> to vector<2x32xf32>
    %133 = vector.extract_strided_slice %130 {offsets = [0, 32], sizes = [2, 32], strides = [1, 1]} : vector<2x128xf32> to vector<2x32xf32>
    %134 = vector.extract_strided_slice %131 {offsets = [0, 64], sizes = [2, 32], strides = [1, 1]} : vector<2x128xf32> to vector<2x32xf32>
    %135 = vector.extract_strided_slice %130 {offsets = [0, 96], sizes = [2, 32], strides = [1, 1]} : vector<2x128xf32> to vector<2x32xf32>
    %136 = arith.mulf %133, %119 : vector<2x32xf32>
    %137 = arith.mulf %132, %134 : vector<2x32xf32>
    %138 = arith.addf %136, %137 : vector<2x32xf32>
    %139 = math.tanh %138 : vector<2x32xf32>
    %140 = arith.mulf %135, %139 : vector<2x32xf32>
    %141 = vector.extract_strided_slice %8 {offsets = [0, 7, 0], sizes = [2, 1, 128], strides = [1, 1, 1]} : vector<2x8x128xf32> to vector<2x1x128xf32>
    %142 = vector.shape_cast %141 : vector<2x1x128xf32> to vector<2x128xf32>
    %cst_22 = arith.constant dense<0.000000e+00> : vector<2x128xf32>
    %143 = tpu.matmul %140, %1, %cst_22 {dimension_numbers = #tpu.dot_dimension_numbers<[1], [0], [0], [1], [0, 0, 1, 1], [], []>} : vector<2x32xf32>, vector<32x128xf32>, vector<2x128xf32> -> vector<2x128xf32>
    %144 = arith.addf %142, %143 : vector<2x128xf32>
    %145 = arith.negf %144 : vector<2x128xf32>
    %146 = math.exp %145 : vector<2x128xf32>
    %cst_23 = arith.constant 1.000000e+00 : f32
    %147 = vector.broadcast %cst_23 : f32 to vector<2x128xf32>
    %148 = arith.addf %147, %146 : vector<2x128xf32>
    %149 = arith.divf %147, %148 : vector<2x128xf32>
    %150 = math.tanh %144 : vector<2x128xf32>
    %151 = vector.extract_strided_slice %149 {offsets = [0, 0], sizes = [2, 32], strides = [1, 1]} : vector<2x128xf32> to vector<2x32xf32>
    %152 = vector.extract_strided_slice %149 {offsets = [0, 32], sizes = [2, 32], strides = [1, 1]} : vector<2x128xf32> to vector<2x32xf32>
    %153 = vector.extract_strided_slice %150 {offsets = [0, 64], sizes = [2, 32], strides = [1, 1]} : vector<2x128xf32> to vector<2x32xf32>
    %154 = vector.extract_strided_slice %149 {offsets = [0, 96], sizes = [2, 32], strides = [1, 1]} : vector<2x128xf32> to vector<2x32xf32>
    %155 = arith.mulf %152, %138 : vector<2x32xf32>
    %156 = arith.mulf %151, %153 : vector<2x32xf32>
    %157 = arith.addf %155, %156 : vector<2x32xf32>
    %158 = math.tanh %157 : vector<2x32xf32>
    %159 = arith.mulf %154, %158 : vector<2x32xf32>
    %c0_24 = arith.constant 0 : index
    %c0_25 = arith.constant 0 : index
    %160 = vector.load %arg4[%c0_24, %c0_25] : memref<32x128xf32, #tpu.memory_space<vmem>>, vector<32x128xf32>
    %c0_26 = arith.constant 0 : index
    %c0_27 = arith.constant 0 : index
    %161 = vector.load %arg5[%c0_26, %c0_27] : memref<1x128xf32, #tpu.memory_space<vmem>>, vector<1x128xf32>
    %cst_28 = arith.constant dense<0.000000e+00> : vector<2x128xf32>
    %162 = tpu.matmul %159, %160, %cst_28 {dimension_numbers = #tpu.dot_dimension_numbers<[1], [0], [0], [1], [0, 0, 1, 1], [], []>} : vector<2x32xf32>, vector<32x128xf32>, vector<2x128xf32> -> vector<2x128xf32>
    %163 = vector.broadcast %161 : vector<1x128xf32> to vector<2x128xf32>
    %164 = arith.addf %162, %163 : vector<2x128xf32>
    %165 = vector.extract_strided_slice %164 {offsets = [0, 0], sizes = [2, 1], strides = [1, 1]} : vector<2x128xf32> to vector<2x1xf32>
    %166 = arith.negf %165 : vector<2x1xf32>
    %167 = math.exp %166 : vector<2x1xf32>
    %cst_29 = arith.constant 1.000000e+00 : f32
    %168 = vector.broadcast %cst_29 : f32 to vector<2x1xf32>
    %169 = arith.addf %168, %167 : vector<2x1xf32>
    %170 = arith.divf %168, %169 : vector<2x1xf32>
    %c0_30 = arith.constant 0 : index
    %c0_31 = arith.constant 0 : index
    %171 = vector.load %arg6[%c0_30, %c0_31] : memref<2x1xf32, #tpu.memory_space<vmem>>, vector<2x1xf32>
    tpu.vector_store %arg6[%c0_30, %c0_31], %170 {strides = array<i32>} : memref<2x1xf32, #tpu.memory_space<vmem>>, vector<2x1xf32>,
    return
  }
}

</mosaic_0001>

<bundles_post_ra>
// kernel: candle_lstm_forward.1
= control target key start
LH: loop header
LB: loop body
LE: loop exit
PB: predicated region body
PF: predicated region fallthrough
CT: control target
= control target key end

     0   :  { %11 = vsyncpa [#allocation3], 0  ;;  %s1645_s21 = smov [#allocation2]   ;;  %s1882_s0 = inlined_call_operand.vmem [shape: f32[2,8,4], index: 0, kind: input, shape index: {}]   ;;  %s1883_s1 = inlined_call_operand.vmem [shape: f32[4,128], index: 1, kind: input, shape index: {}]   ;;  %s1884_s2 = inlined_call_operand.hbm [shape: f32[32,128], index: 2, kind: input, shape index: {}]   ;;  %s1885_s3 = inlined_call_operand.vmem [shape: f32[1,128], index: 3, kind: input, shape index: {}]   ;;  %s1886_s4 = inlined_call_operand.vmem [shape: f32[32,128], index: 4, kind: input, shape index: {}]   ;;  %s1887_s5 = inlined_call_operand.vmem [shape: f32[1,128], index: 5, kind: input, shape index: {}]   ;;  %s1888_s6 = inlined_call_operand.vmem [shape: f32[2,1], index: 6, kind: output, shape index: {}]  }
   0x1   :  { %s21_s22 = sshll.u32 %s1645_s21, 4  ;;  %s1621_s25 = scalar_lea.hbm %s1884_s2, 512  ;;  %s22_s22 = int_to_ptr.vmem [resolvable:$true] %s21_s22 }
   0x2   :  { %p1622_p0 = scmp.ne.s32.totalorder %s1884_s2, %s1621_s25  ;;  %p1625_p1 = scmp.lt.u32.totalorder %s1621_s25, %s1884_s2 }
   0x4   :  { %p1627_p2 = pnand %p1625_p1, %p1622_p0 }
   0x6   :  { %1630 = shalt.err (!%p1627_p2)
}
   0x7   :  { %s1631_s30 = scalar_lea.vmem %s22_s22, 512  ;;  %p1636_p4 = scmp.lt.s32.totalorder %s22_s22, %s22_s22 }
   0x8   :  { %p1632_p3 = scmp.ne.s32.totalorder %s22_s22, %s1631_s30  ;;  %p1637_p5 = scmp.lt.s32.totalorder %s1631_s30, %s1631_s30 }
   0xa   :  { %p1638_p6 = por %p1637_p5, %p1636_p4 }
   0xc   :  { %p1639_p7 = pnand %p1638_p6, %p1632_p3 }
   0xe   :  { %1642 = shalt.err (!%p1639_p7)
}
   0xf   :  { %s1646_s7 = smov 128   ;;  %s1647_s8 = smov 8  }
  0x10   :  { %27 = dma.hbm_to_vmem [thread:$0]  %s1884_s2, 512, %s22_s22, [#allocation3], %s1646_s7, %s1646_s7, %s1647_s8  }
  0x11   :  { %1643 = dma.done.wait [#allocation3], 512  }
  0x12   :  { %1644 = vsyncadd [#allocation3], 4294966784  ;;  %vm58_vm0 = vcmask 1043456   ;;  %vm51_vm1 = vcmask 31744   ;;  %v37_v0 = vld [vmem:[%s1883_s1] sm:$0xf] }
  0x13   :  { %v43_v1 = vld [vmem:[%s1882_s0] sm:$0xff]  ;;  %v44_v2 = vld [vmem:[%s1882_s0 + $0x8] sm:$0xff]  ;;  %1340 = vmatprep.subr.msk.mxu0 %vm58_vm0, %v37_v0  ;;  %s1648_s0 = smov 64   ;;  %s1649_s1 = smov 32   ;;  %v40_v30 = vld [vmem:[#allocation2 + $0x10] sm:$0xff]  ;;  %v1650_v31 = vmov 0.0|0.0  }
  0x14   :  { %1342 = vmatprep.mubr.msk.f32.mxu0 %vm51_vm1, %v43_v1  ;;  %1341 = vmatpush3.msk.msra.mxu0 %vm58_vm0, %v37_v0  ;;  %v1267_v3 = vld [vmem:[%s1885_s3] ss:$0 sm:$0xff]  ;;  %v39_v29 = vld [vmem:[#allocation2 + $0x8] sm:$0xff]  ;;  %v41_v33 = vld [vmem:[#allocation2 + $0x18] sm:$0xff]  ;;  %vm1651_vm2 = vmmov 0   ;;  %v1652_v34 = vmov 0.0  }
  0x15   :  { %1343 = vmatmul.mubr.msk.f32.vlgmr.msra.gmra.mrb[0].mxu0 %vm51_vm1, %v44_v2  ;;  %v38_v28 = vld [vmem:[#allocation2] sm:$0xff]  ;;  %1433 = vmatprep.subr.bf16.mxu1 %v1650_v31  ;;  %v1739_v35 = vpack.c.bf16 %v41_v33, %v40_v30  ;;  %vm188_vm3 = vcmask 1041409   ;;  %vm192_vm4 = vcmask 261120   ;;  %vm1260_vm5 = vcmask 1024  }
  0x16   :  { %v1731_v32 = vpack.c.bf16 %v39_v29, %v38_v28  ;;  %1353 = vmatprep.mubr.msk.f32.mxu1 %vm1651_vm2, %v1652_v34  ;;  %1439 = vmatprep.subr.bf16.mxu0 %v1650_v31 }
  0x17   :  { %1364 = vmatprep.mubr.msk.f32.mxu0 %vm1651_vm2, %v1652_v34 }
  0x18   :  { %1435 = vmatpush3.bf16.msra.mxu1 %v1731_v32  ;;  %1441 = vmatpush3.bf16.msra.mxu0 %v1731_v32 }
  0x19   :  { %1436 = vmatprep.subr.bf16.mxu1 %v1650_v31  ;;  %1442 = vmatprep.subr.bf16.mxu0 %v1650_v31 }
  0x1c   :  { %1438 = vmatpush3.bf16.msra.mxu1 %v1739_v35  ;;  %1444 = vmatpush3.bf16.msra.mxu0 %v1739_v35 }
  0x1d   :  { %1445 = vmatprep.subr.bf16.mxu1 %v1650_v31  ;;  %1451 = vmatprep.subr.bf16.mxu0 %v1650_v31 }
  0xe8   :  { %v1344_v4 = vpop.f32.mrb[0].mxu0 }
  0xe9   :  { %v1712_v5 = vadd.f32 %v1344_v4, %v1267_v3  ;;  %v128_v6 = vpop.f32.mrb[1].mxu0 }
  0xea   :  { %v1714_v7 = vadd.f32 %v1267_v3, %v128_v6 }
  0xeb   :  { %1489 = vtanh.f32 %v1712_v5  ;;  %v1272_v10 = vmul.f32 -1.442695, %v1712_v5 }
  0xec   :  { %1491 = vtanh.f32 %v1714_v7  ;;  %v1271_v11 = vmul.f32 -1.442695, %v1714_v7 }
  0xed   :  { %1493 = vpow2.f32 %v1272_v10 }
  0xee   :  { %1495 = vpow2.f32 %v1271_v11 }
  0xf5   :  { %v1490_v8 = vpop.eup %1489 }
  0xf6   :  { %157 = vrot.lane.b32.xlu0 %v1490_v8, %s1648_s0  ;;  %v1492_v9 = vpop.eup %1491 }
  0xf7   :  { %v1494_v12 = vpop.eup %1493 }
  0xf8   :  { %v144_v13 = vadd.f32 1.0, %v1494_v12  ;;  %v1496_v14 = vpop.eup %1495 }
  0xf9   :  { %v143_v15 = vadd.f32 1.0, %v1496_v14 }
  0xfa   :  { %155 = vrot.lane.b32.xlu0 %v1492_v9, %s1648_s0  ;;  %1497 = vrcp.f32 %v144_v13 }
  0xfb   :  { %1499 = vrcp.f32 %v143_v15 }
 0x104   :  { %v1498_v16 = vpop.eup %1497 }
 0x105   :  { %v1500_v19 = vpop.eup %1499  ;;  %v152_v22 = vmul.f32 0.0, %v1498_v16 }
 0x106   :  { %v151_v25 = vmul.f32 0.0, %v1500_v19 }
 0x168   :  { %v158_v17 = vpop.permute.xlu0 %157 }
 0x169   :  { %v162_v18 = vmul.f32 %v1498_v16, %v158_v17 }
 0x16b   :  { %167 = vrot.lane.b32.xlu1 %v162_v18, %s1649_s1 }
 0x16c   :  { %v156_v20 = vpop.permute.xlu0 %155 }
 0x16d   :  { %v161_v21 = vmul.f32 %v1500_v19, %v156_v20 }
 0x16f   :  { %165 = vrot.lane.b32.xlu1 %v161_v21, %s1649_s1 }
 0x1dd   :  { %v168_v23 = vpop.permute.xlu1 %167 }
 0x1de   :  { %v1724_v24 = vadd.f32 %v168_v23, %v152_v22 }
 0x1e0   :  { %1501 = vtanh.f32 %v1724_v24  ;;  %v288_v0 = vrot.slane %v1724_v24, 7 }
 0x1e1   :  { %v166_v26 = vpop.permute.xlu1 %165 }
 0x1e2   :  { %v1727_v27 = vadd.f32 %v166_v26, %v151_v25 }
 0x1e4   :  { %1503 = vtanh.f32 %v1727_v27  ;;  %v287_v2 = vrot.slane %v1727_v27, 7 }
 0x1ea   :  { %v1502_v36 = vpop.eup %1501 }
 0x1eb   :  { %179 = vrot.lane.b32.xlu0 %v1502_v36, %s1648_s0 }
 0x1ee   :  { %v1504_v37 = vpop.eup %1503 }
 0x1ef   :  { %177 = vrot.lane.b32.xlu1 %v1504_v37, %s1648_s0 }
 0x25d   :  { %v180_v38 = vpop.permute.xlu0 %179 }
 0x25e   :  { %v184_v39 = vmul.f32 %v1498_v16, %v180_v38 }
 0x260   :  { %v187_v41 = vrot.slane %v184_v39, 7 }
 0x261   :  { %v178_v40 = vpop.permute.xlu1 %177 }
 0x262   :  { %v183_v42 = vmul.f32 %v1500_v19, %v178_v40 }
 0x264   :  { %v189_v43 = vsel %vm188_vm3, %v187_v41, %v183_v42 }
 0x265   :  { %190 = vrot.lane.b32.xlu0 %v189_v43, %s1649_s1 }
 0x2d7   :  { %v191_v44 = vpop.permute.xlu0 %190 }
 0x2d8   :  { %1354 = vmatmul.mubr.msk.f32.vlgmr.msra.gmra.mrb[0].mxu1 %vm192_vm4, %v191_v44 }
 0x2d9   :  { %1447 = vmatpush3.bf16.msra.mxu1 %v1731_v32  ;;  %1375 = vmatprep.mubr.msk.f32.mxu1 %vm1651_vm2, %v1652_v34 }
 0x2da   :  { %1448 = vmatprep.subr.bf16.mxu1 %v1650_v31 }
 0x2dd   :  { %1450 = vmatpush3.bf16.msra.mxu1 %v1739_v35 }
 0x2de   :  { %1457 = vmatprep.subr.bf16.mxu1 %v1650_v31 }
 0x3ab   :  { %v261_v45 = vpop.f32.mrb[0].mxu1 }
 0x3ac   :  { %v266_v46 = vrot.slane %v261_v45, 7  ;;  %v270_v47 = vadd.f32 %v261_v45, %v1712_v5  ;;  %v1355_v48 = vpop.f32.mrb[1].mxu1 }
 0x3ae   :  { %v269_v49 = vadd.f32 %v266_v46, %v1714_v7  ;;  %1505 = vtanh.f32 %v270_v47  ;;  %v1275_v52 = vmul.f32 -1.442695, %v270_v47 }
 0x3b0   :  { %1507 = vtanh.f32 %v269_v49  ;;  %v1274_v53 = vmul.f32 -1.442695, %v269_v49 }
 0x3b1   :  { %1509 = vpow2.f32 %v1275_v52 }
 0x3b2   :  { %1511 = vpow2.f32 %v1274_v53 }
 0x3b8   :  { %v1506_v50 = vpop.eup %1505 }
 0x3b9   :  { %297 = vrot.lane.b32.xlu0 %v1506_v50, %s1648_s0 }
 0x3ba   :  { %v1508_v51 = vpop.eup %1507 }
 0x3bb   :  { %295 = vrot.lane.b32.xlu1 %v1508_v51, %s1648_s0  ;;  %v1510_v54 = vpop.eup %1509 }
 0x3bc   :  { %v1512_v55 = vpop.eup %1511  ;;  %v278_v56 = vadd.f32 1.0, %v1510_v54 }
 0x3bd   :  { %v277_v57 = vadd.f32 1.0, %v1512_v55 }
 0x3be   :  { %1513 = vrcp.f32 %v278_v56 }
 0x3bf   :  { %1515 = vrcp.f32 %v277_v57 }
 0x3c8   :  { %v1514_v58 = vpop.eup %1513 }
 0x3c9   :  { %v1516_v61 = vpop.eup %1515  ;;  %v292_v1 = vmul.f32 %v1514_v58, %v288_v0 }
 0x3ca   :  { %v291_v6 = vmul.f32 %v1516_v61, %v287_v2 }
 0x42b   :  { %v298_v59 = vpop.permute.xlu0 %297 }
 0x42c   :  { %v302_v60 = vmul.f32 %v1514_v58, %v298_v59 }
 0x42d   :  { %v296_v62 = vpop.permute.xlu1 %295 }
 0x42e   :  { %307 = vrot.lane.b32.xlu0 %v302_v60, %s1649_s1  ;;  %v301_v63 = vmul.f32 %v1516_v61, %v296_v62 }
 0x430   :  { %305 = vrot.lane.b32.xlu1 %v301_v63, %s1649_s1 }
 0x4a0   :  { %v308_v3 = vpop.permute.xlu0 %307 }
 0x4a1   :  { %v312_v4 = vadd.f32 %v308_v3, %v292_v1 }
 0x4a2   :  { %v306_v8 = vpop.permute.xlu1 %305 }
 0x4a3   :  { %1517 = vtanh.f32 %v312_v4  ;;  %v311_v9 = vadd.f32 %v306_v8, %v291_v6  ;;  %v427_v44 = vrot.slane %v312_v4, 7 }
 0x4a5   :  { %1519 = vtanh.f32 %v311_v9  ;;  %v426_v43 = vrot.slane %v311_v9, 7 }
 0x4ad   :  { %v1518_v10 = vpop.eup %1517 }
 0x4ae   :  { %319 = vrot.lane.b32.xlu0 %v1518_v10, %s1648_s0 }
 0x4af   :  { %v1520_v11 = vpop.eup %1519 }
 0x4b0   :  { %317 = vrot.lane.b32.xlu1 %v1520_v11, %s1648_s0 }
 0x520   :  { %v320_v12 = vpop.permute.xlu0 %319 }
 0x521   :  { %v324_v15 = vmul.f32 %v1514_v58, %v320_v12 }
 0x522   :  { %v318_v13 = vpop.permute.xlu1 %317 }
 0x523   :  { %v323_v14 = vmul.f32 %v1516_v61, %v318_v13 }
 0x525   :  { %v327_v16 = vrot.slane %v323_v14, 1 }
 0x527   :  { %v328_v17 = vsel %vm188_vm3, %v324_v15, %v327_v16 }
 0x528   :  { %329 = vrot.lane.b32.xlu1 %v328_v17, %s1649_s1 }
 0x59a   :  { %v330_v18 = vpop.permute.xlu1 %329 }
 0x59b   :  { %1365 = vmatmul.mubr.msk.f32.vlgmr.msra.gmra.mrb[2].mxu0 %vm192_vm4, %v330_v18 }
 0x59c   :  { %1453 = vmatpush3.bf16.msra.mxu0 %v1731_v32  ;;  %1386 = vmatprep.mubr.msk.f32.mxu0 %vm1651_vm2, %v1652_v34 }
 0x59d   :  { %1454 = vmatprep.subr.bf16.mxu0 %v1650_v31 }
 0x5a0   :  { %1456 = vmatpush3.bf16.msra.mxu0 %v1739_v35 }
 0x5a1   :  { %1463 = vmatprep.subr.bf16.mxu0 %v1650_v31 }
 0x66e   :  { %v399_v19 = vpop.f32.mrb[2].mxu0 }
 0x66f   :  { %v404_v20 = vrot.slane %v399_v19, 6  ;;  %v405_v21 = vrot.slane %v399_v19, 7  ;;  %v1366_v22 = vpop.f32.mrb[3].mxu0 }
 0x671   :  { %v408_v23 = vadd.f32 %v404_v20, %v1714_v7  ;;  %v409_v24 = vadd.f32 %v405_v21, %v1712_v5 }
 0x673   :  { %1521 = vtanh.f32 %v408_v23  ;;  %v1277_v27 = vmul.f32 -1.442695, %v408_v23  ;;  %v1278_v28 = vmul.f32 -1.442695, %v409_v24 }
 0x674   :  { %1523 = vtanh.f32 %v409_v24 }
 0x675   :  { %1525 = vpow2.f32 %v1277_v27 }
 0x676   :  { %1527 = vpow2.f32 %v1278_v28 }
 0x67d   :  { %v1522_v25 = vpop.eup %1521 }
 0x67e   :  { %v1524_v26 = vpop.eup %1523  ;;  %434 = vrot.lane.b32.xlu0 %v1522_v25, %s1648_s0 }
 0x67f   :  { %436 = vrot.lane.b32.xlu1 %v1524_v26, %s1648_s0  ;;  %v1526_v29 = vpop.eup %1525 }
 0x680   :  { %v1528_v30 = vpop.eup %1527  ;;  %v416_v33 = vadd.f32 1.0, %v1526_v29 }
 0x681   :  { %v417_v36 = vadd.f32 1.0, %v1528_v30 }
 0x682   :  { %1529 = vrcp.f32 %v416_v33 }
 0x683   :  { %1531 = vrcp.f32 %v417_v36 }
 0x68c   :  { %v1530_v37 = vpop.eup %1529 }
 0x68d   :  { %v1532_v39 = vpop.eup %1531  ;;  %v430_v45 = vmul.f32 %v1530_v37, %v426_v43 }
 0x68e   :  { %v431_v46 = vmul.f32 %v1532_v39, %v427_v44 }
 0x6f0   :  { %v435_v38 = vpop.permute.xlu0 %434 }
 0x6f1   :  { %v437_v40 = vpop.permute.xlu1 %436  ;;  %v440_v41 = vmul.f32 %v1530_v37, %v435_v38 }
 0x6f2   :  { %v441_v42 = vmul.f32 %v1532_v39, %v437_v40 }
 0x6f3   :  { %444 = vrot.lane.b32.xlu0 %v440_v41, %s1649_s1 }
 0x6f4   :  { %446 = vrot.lane.b32.xlu1 %v441_v42, %s1649_s1 }
 0x765   :  { %v445_v47 = vpop.permute.xlu0 %444 }
 0x766   :  { %v447_v48 = vpop.permute.xlu1 %446  ;;  %v450_v49 = vadd.f32 %v445_v47, %v430_v45 }
 0x767   :  { %v451_v50 = vadd.f32 %v447_v48, %v431_v46 }
 0x768   :  { %1533 = vtanh.f32 %v450_v49  ;;  %v566_v19 = vrot.slane %v450_v49, 7 }
 0x769   :  { %1535 = vtanh.f32 %v451_v50  ;;  %v567_v20 = vrot.slane %v451_v50, 7 }
 0x772   :  { %v1534_v51 = vpop.eup %1533 }
 0x773   :  { %v1536_v52 = vpop.eup %1535  ;;  %456 = vrot.lane.b32.xlu0 %v1534_v51, %s1648_s0 }
 0x774   :  { %458 = vrot.lane.b32.xlu1 %v1536_v52, %s1648_s0 }
 0x7e5   :  { %v457_v53 = vpop.permute.xlu0 %456 }
 0x7e6   :  { %v459_v54 = vpop.permute.xlu1 %458  ;;  %v462_v55 = vmul.f32 %v1530_v37, %v457_v53 }
 0x7e7   :  { %v463_v56 = vmul.f32 %v1532_v39, %v459_v54 }
 0x7e8   :  { %v466_v57 = vrot.slane %v462_v55, 2 }
 0x7e9   :  { %v467_v58 = vrot.slane %v463_v56, 1 }
 0x7eb   :  { %v468_v59 = vsel %vm188_vm3, %v467_v58, %v466_v57 }
 0x7ec   :  { %469 = vrot.lane.b32.xlu0 %v468_v59, %s1649_s1 }
 0x85e   :  { %v470_v60 = vpop.permute.xlu0 %469 }
 0x85f   :  { %1376 = vmatmul.mubr.msk.f32.vlgmr.msra.gmra.mrb[2].mxu1 %vm192_vm4, %v470_v60 }
 0x860   :  { %1459 = vmatpush3.bf16.msra.mxu1 %v1731_v32  ;;  %1397 = vmatprep.mubr.msk.f32.mxu1 %vm1651_vm2, %v1652_v34 }
 0x861   :  { %1460 = vmatprep.subr.bf16.mxu1 %v1650_v31 }
 0x864   :  { %1462 = vmatpush3.bf16.msra.mxu1 %v1739_v35 }
 0x865   :  { %1469 = vmatprep.subr.bf16.mxu1 %v1650_v31 }
 0x932   :  { %v539_v61 = vpop.f32.mrb[2].mxu1 }
 0x933   :  { %v544_v62 = vrot.slane %v539_v61, 5  ;;  %v545_v63 = vrot.slane %v539_v61, 6  ;;  %v1377_v0 = vpop.f32.mrb[3].mxu1 }
 0x935   :  { %v548_v1 = vadd.f32 %v544_v62, %v1714_v7  ;;  %v549_v2 = vadd.f32 %v545_v63, %v1712_v5 }
 0x937   :  { %1537 = vtanh.f32 %v548_v1  ;;  %v1280_v6 = vmul.f32 -1.442695, %v548_v1  ;;  %v1281_v8 = vmul.f32 -1.442695, %v549_v2 }
 0x938   :  { %1539 = vtanh.f32 %v549_v2 }
 0x939   :  { %1541 = vpow2.f32 %v1280_v6 }
 0x93a   :  { %1543 = vpow2.f32 %v1281_v8 }
 0x941   :  { %v1538_v3 = vpop.eup %1537 }
 0x942   :  { %v1540_v4 = vpop.eup %1539  ;;  %574 = vrot.lane.b32.xlu1 %v1538_v3, %s1648_s0 }
 0x943   :  { %576 = vrot.lane.b32.xlu0 %v1540_v4, %s1648_s0  ;;  %v1542_v9 = vpop.eup %1541 }
 0x944   :  { %v1544_v10 = vpop.eup %1543  ;;  %v556_v11 = vadd.f32 1.0, %v1542_v9 }
 0x945   :  { %v557_v12 = vadd.f32 1.0, %v1544_v10 }
 0x946   :  { %1545 = vrcp.f32 %v556_v11 }
 0x947   :  { %1547 = vrcp.f32 %v557_v12 }
 0x950   :  { %v1546_v13 = vpop.eup %1545 }
 0x951   :  { %v1548_v15 = vpop.eup %1547  ;;  %v570_v21 = vmul.f32 %v1546_v13, %v566_v19 }
 0x952   :  { %v571_v22 = vmul.f32 %v1548_v15, %v567_v20 }
 0x9b4   :  { %v575_v14 = vpop.permute.xlu1 %574 }
 0x9b5   :  { %v577_v16 = vpop.permute.xlu0 %576  ;;  %v580_v17 = vmul.f32 %v1546_v13, %v575_v14 }
 0x9b6   :  { %v581_v18 = vmul.f32 %v1548_v15, %v577_v16 }
 0x9b7   :  { %584 = vrot.lane.b32.xlu1 %v580_v17, %s1649_s1 }
 0x9b8   :  { %586 = vrot.lane.b32.xlu0 %v581_v18, %s1649_s1 }
 0xa29   :  { %v585_v23 = vpop.permute.xlu1 %584 }
 0xa2a   :  { %v587_v24 = vpop.permute.xlu0 %586  ;;  %v590_v25 = vadd.f32 %v585_v23, %v570_v21 }
 0xa2b   :  { %v591_v26 = vadd.f32 %v587_v24, %v571_v22 }
 0xa2c   :  { %1549 = vtanh.f32 %v590_v25  ;;  %v706_v61 = vrot.slane %v590_v25, 7 }
 0xa2d   :  { %1551 = vtanh.f32 %v591_v26  ;;  %v707_v62 = vrot.slane %v591_v26, 7 }
 0xa36   :  { %v1550_v27 = vpop.eup %1549 }
 0xa37   :  { %v1552_v28 = vpop.eup %1551  ;;  %596 = vrot.lane.b32.xlu1 %v1550_v27, %s1648_s0 }
 0xa38   :  { %598 = vrot.lane.b32.xlu0 %v1552_v28, %s1648_s0 }
 0xaa9   :  { %v597_v29 = vpop.permute.xlu1 %596 }
 0xaaa   :  { %v599_v30 = vpop.permute.xlu0 %598  ;;  %v602_v33 = vmul.f32 %v1546_v13, %v597_v29 }
 0xaab   :  { %v603_v36 = vmul.f32 %v1548_v15, %v599_v30 }
 0xaac   :  { %v606_v37 = vrot.slane %v602_v33, 3 }
 0xaad   :  { %v607_v38 = vrot.slane %v603_v36, 2 }
 0xaaf   :  { %v608_v39 = vsel %vm188_vm3, %v607_v38, %v606_v37 }
 0xab0   :  { %609 = vrot.lane.b32.xlu1 %v608_v39, %s1649_s1 }
 0xb22   :  { %v610_v40 = vpop.permute.xlu1 %609 }
 0xb23   :  { %1387 = vmatmul.mubr.msk.f32.vlgmr.msra.gmra.mrb[4].mxu0 %vm192_vm4, %v610_v40 }
 0xb24   :  { %1465 = vmatpush3.bf16.msra.mxu0 %v1731_v32  ;;  %1408 = vmatprep.mubr.msk.f32.mxu0 %vm1651_vm2, %v1652_v34 }
 0xb25   :  { %1466 = vmatprep.subr.bf16.mxu0 %v1650_v31 }
 0xb28   :  { %1468 = vmatpush3.bf16.msra.mxu0 %v1739_v35 }
 0xb29   :  { %1475 = vmatprep.subr.bf16.mxu0 %v1650_v31 }
 0xbf6   :  { %v679_v41 = vpop.f32.mrb[4].mxu0 }
 0xbf7   :  { %v684_v42 = vrot.slane %v679_v41, 4  ;;  %v685_v43 = vrot.slane %v679_v41, 5  ;;  %v1388_v44 = vpop.f32.mrb[5].mxu0 }
 0xbf9   :  { %v688_v45 = vadd.f32 %v684_v42, %v1714_v7  ;;  %v689_v46 = vadd.f32 %v685_v43, %v1712_v5 }
 0xbfb   :  { %1553 = vtanh.f32 %v688_v45  ;;  %v1283_v49 = vmul.f32 -1.442695, %v688_v45  ;;  %v1284_v50 = vmul.f32 -1.442695, %v689_v46 }
 0xbfc   :  { %1555 = vtanh.f32 %v689_v46 }
 0xbfd   :  { %1557 = vpow2.f32 %v1283_v49 }
 0xbfe   :  { %1559 = vpow2.f32 %v1284_v50 }
 0xc05   :  { %v1554_v47 = vpop.eup %1553 }
 0xc06   :  { %v1556_v48 = vpop.eup %1555  ;;  %714 = vrot.lane.b32.xlu0 %v1554_v47, %s1648_s0 }
 0xc07   :  { %716 = vrot.lane.b32.xlu1 %v1556_v48, %s1648_s0  ;;  %v1558_v51 = vpop.eup %1557 }
 0xc08   :  { %v1560_v52 = vpop.eup %1559  ;;  %v696_v53 = vadd.f32 1.0, %v1558_v51 }
 0xc09   :  { %v697_v54 = vadd.f32 1.0, %v1560_v52 }
 0xc0a   :  { %1561 = vrcp.f32 %v696_v53 }
 0xc0b   :  { %1563 = vrcp.f32 %v697_v54 }
 0xc14   :  { %v1562_v55 = vpop.eup %1561 }
 0xc15   :  { %v1564_v57 = vpop.eup %1563  ;;  %v710_v63 = vmul.f32 %v1562_v55, %v706_v61 }
 0xc16   :  { %v711_v0 = vmul.f32 %v1564_v57, %v707_v62 }
 0xc78   :  { %v715_v56 = vpop.permute.xlu0 %714 }
 0xc79   :  { %v717_v58 = vpop.permute.xlu1 %716  ;;  %v720_v59 = vmul.f32 %v1562_v55, %v715_v56 }
 0xc7a   :  { %v721_v60 = vmul.f32 %v1564_v57, %v717_v58 }
 0xc7b   :  { %724 = vrot.lane.b32.xlu0 %v720_v59, %s1649_s1 }
 0xc7c   :  { %726 = vrot.lane.b32.xlu1 %v721_v60, %s1649_s1 }
 0xced   :  { %v725_v1 = vpop.permute.xlu0 %724 }
 0xcee   :  { %v727_v2 = vpop.permute.xlu1 %726  ;;  %v730_v3 = vadd.f32 %v725_v1, %v710_v63 }
 0xcef   :  { %v731_v4 = vadd.f32 %v727_v2, %v711_v0 }
 0xcf0   :  { %1565 = vtanh.f32 %v730_v3  ;;  %v846_v39 = vrot.slane %v730_v3, 7 }
 0xcf1   :  { %1567 = vtanh.f32 %v731_v4  ;;  %v847_v40 = vrot.slane %v731_v4, 7 }
 0xcfa   :  { %v1566_v6 = vpop.eup %1565 }
 0xcfb   :  { %v1568_v8 = vpop.eup %1567  ;;  %736 = vrot.lane.b32.xlu0 %v1566_v6, %s1648_s0 }
 0xcfc   :  { %738 = vrot.lane.b32.xlu1 %v1568_v8, %s1648_s0 }
 0xd6d   :  { %v737_v9 = vpop.permute.xlu0 %736 }
 0xd6e   :  { %v739_v10 = vpop.permute.xlu1 %738  ;;  %v742_v11 = vmul.f32 %v1562_v55, %v737_v9 }
 0xd6f   :  { %v743_v12 = vmul.f32 %v1564_v57, %v739_v10 }
 0xd70   :  { %v746_v13 = vrot.slane %v742_v11, 4 }
 0xd71   :  { %v747_v14 = vrot.slane %v743_v12, 3 }
 0xd73   :  { %v748_v15 = vsel %vm188_vm3, %v747_v14, %v746_v13 }
 0xd74   :  { %749 = vrot.lane.b32.xlu0 %v748_v15, %s1649_s1 }
 0xde6   :  { %v750_v16 = vpop.permute.xlu0 %749 }
 0xde7   :  { %1398 = vmatmul.mubr.msk.f32.vlgmr.msra.gmra.mrb[4].mxu1 %vm192_vm4, %v750_v16 }
 0xde8   :  { %1471 = vmatpush3.bf16.msra.mxu1 %v1731_v32  ;;  %1419 = vmatprep.mubr.msk.f32.mxu1 %vm1651_vm2, %v1652_v34 }
 0xde9   :  { %1472 = vmatprep.subr.bf16.mxu1 %v1650_v31 }
 0xdec   :  { %1474 = vmatpush3.bf16.msra.mxu1 %v1739_v35 }
 0xeba   :  { %v819_v17 = vpop.f32.mrb[4].mxu1 }
 0xebb   :  { %v824_v18 = vrot.slane %v819_v17, 3  ;;  %v825_v19 = vrot.slane %v819_v17, 4  ;;  %v1399_v20 = vpop.f32.mrb[5].mxu1 }
 0xebd   :  { %v828_v21 = vadd.f32 %v824_v18, %v1714_v7  ;;  %v829_v22 = vadd.f32 %v825_v19, %v1712_v5 }
 0xebf   :  { %1569 = vtanh.f32 %v828_v21  ;;  %v1286_v32 = vmul.f32 -1.442695, %v828_v21  ;;  %v1287_v25 = vmul.f32 -1.442695, %v829_v22 }
 0xec0   :  { %1571 = vtanh.f32 %v829_v22 }
 0xec1   :  { %1573 = vpow2.f32 %v1286_v32 }
 0xec2   :  { %1575 = vpow2.f32 %v1287_v25 }
 0xec9   :  { %v1570_v23 = vpop.eup %1569 }
 0xeca   :  { %v1572_v24 = vpop.eup %1571  ;;  %854 = vrot.lane.b32.xlu1 %v1570_v23, %s1648_s0 }
 0xecb   :  { %856 = vrot.lane.b32.xlu0 %v1572_v24, %s1648_s0  ;;  %v1574_v35 = vpop.eup %1573 }
 0xecc   :  { %v1576_v26 = vpop.eup %1575  ;;  %v836_v27 = vadd.f32 1.0, %v1574_v35 }
 0xecd   :  { %v837_v28 = vadd.f32 1.0, %v1576_v26 }
 0xece   :  { %1577 = vrcp.f32 %v836_v27 }
 0xecf   :  { %1579 = vrcp.f32 %v837_v28 }
 0xed8   :  { %v1578_v29 = vpop.eup %1577 }
 0xed9   :  { %v1580_v33 = vpop.eup %1579  ;;  %v850_v41 = vmul.f32 %v1578_v29, %v846_v39 }
 0xeda   :  { %v851_v42 = vmul.f32 %v1580_v33, %v847_v40 }
 0xf3c   :  { %v855_v30 = vpop.permute.xlu1 %854 }
 0xf3d   :  { %v857_v36 = vpop.permute.xlu0 %856  ;;  %v860_v37 = vmul.f32 %v1578_v29, %v855_v30 }
 0xf3e   :  { %v861_v38 = vmul.f32 %v1580_v33, %v857_v36 }
 0xf3f   :  { %864 = vrot.lane.b32.xlu1 %v860_v37, %s1649_s1 }
 0xf40   :  { %866 = vrot.lane.b32.xlu0 %v861_v38, %s1649_s1 }
 0xfb1   :  { %v865_v43 = vpop.permute.xlu1 %864 }
 0xfb2   :  { %v867_v44 = vpop.permute.xlu0 %866  ;;  %v870_v45 = vadd.f32 %v865_v43, %v850_v41 }
 0xfb3   :  { %v871_v46 = vadd.f32 %v867_v44, %v851_v42 }
 0xfb4   :  { %1581 = vtanh.f32 %v870_v45  ;;  %v986_v14 = vrot.slane %v870_v45, 7 }
 0xfb5   :  { %1583 = vtanh.f32 %v871_v46  ;;  %v987_v15 = vrot.slane %v871_v46, 7 }
 0xfbe   :  { %v1582_v47 = vpop.eup %1581 }
 0xfbf   :  { %v1584_v48 = vpop.eup %1583  ;;  %876 = vrot.lane.b32.xlu1 %v1582_v47, %s1648_s0 }
 0xfc0   :  { %878 = vrot.lane.b32.xlu0 %v1584_v48, %s1648_s0 }
0x1031   :  { %v877_v49 = vpop.permute.xlu1 %876 }
0x1032   :  { %v879_v50 = vpop.permute.xlu0 %878  ;;  %v882_v51 = vmul.f32 %v1578_v29, %v877_v49 }
0x1033   :  { %v883_v52 = vmul.f32 %v1580_v33, %v879_v50 }
0x1034   :  { %v886_v53 = vrot.slane %v882_v51, 5 }
0x1035   :  { %v887_v54 = vrot.slane %v883_v52, 4 }
0x1037   :  { %v888_v55 = vsel %vm188_vm3, %v887_v54, %v886_v53 }
0x1038   :  { %889 = vrot.lane.b32.xlu1 %v888_v55, %s1649_s1 }
0x10aa   :  { %v890_v56 = vpop.permute.xlu1 %889 }
0x10ab   :  { %1409 = vmatmul.mubr.msk.f32.vlgmr.msra.gmra.mrb[6].mxu0 %vm192_vm4, %v890_v56 }
0x10ac   :  { %1430 = vmatprep.mubr.msk.f32.mxu0 %vm1651_vm2, %v1652_v34 }
0x117e   :  { %v959_v57 = vpop.f32.mrb[6].mxu0 }
0x117f   :  { %v964_v58 = vrot.slane %v959_v57, 2  ;;  %v965_v59 = vrot.slane %v959_v57, 3  ;;  %v1410_v60 = vpop.f32.mrb[7].mxu0 }
0x1180   :  { %v1164_v60 = vld [vmem:[%s1886_s4] sm:$0xff] }
0x1181   :  { %v968_v61 = vadd.f32 %v964_v58, %v1714_v7  ;;  %v969_v62 = vadd.f32 %v965_v59, %v1712_v5 }
0x1183   :  { %1585 = vtanh.f32 %v968_v61  ;;  %v1289_v1 = vmul.f32 -1.442695, %v968_v61  ;;  %v1290_v2 = vmul.f32 -1.442695, %v969_v62  ;;  %v1165_v61 = vld [vmem:[%s1886_s4 + $0x8] sm:$0xff] }
0x1184   :  { %1587 = vtanh.f32 %v969_v62  ;;  %v1166_v62 = vld [vmem:[%s1886_s4 + $0x10] sm:$0xff] }
0x1185   :  { %1589 = vpow2.f32 %v1289_v1 }
0x1186   :  { %1591 = vpow2.f32 %v1290_v2 }
0x118d   :  { %v1586_v63 = vpop.eup %1585 }
0x118e   :  { %v1588_v0 = vpop.eup %1587  ;;  %994 = vrot.lane.b32.xlu0 %v1586_v63, %s1648_s0  ;;  %v1476_v63 = vpack.c.bf16 %v1165_v61, %v1164_v60 }
0x118f   :  { %996 = vrot.lane.b32.xlu1 %v1588_v0, %s1648_s0  ;;  %v1590_v34 = vpop.eup %1589  ;;  %v1167_v0 = vld [vmem:[%s1886_s4 + $0x18] sm:$0xff] }
0x1190   :  { %v1592_v3 = vpop.eup %1591  ;;  %v976_v4 = vadd.f32 1.0, %v1590_v34  ;;  %1477 = vmatpush3.bf16.msra.mxu0 %v1476_v63  ;;  %v1479_v1 = vpack.c.bf16 %v1167_v0, %v1166_v62 }
0x1191   :  { %v977_v6 = vadd.f32 1.0, %v1592_v3  ;;  %1478 = vmatprep.subr.bf16.mxu0 %v1650_v31  ;;  %v1294_v31 = vld [vmem:[%s1887_s5] ss:$0 sm:$0xff] }
0x1192   :  { %1593 = vrcp.f32 %v976_v4 }
0x1193   :  { %1595 = vrcp.f32 %v977_v6 }
0x1194   :  { %1480 = vmatpush3.bf16.msra.mxu0 %v1479_v1 }
0x119c   :  { %v1594_v8 = vpop.eup %1593 }
0x119d   :  { %v1596_v10 = vpop.eup %1595  ;;  %v990_v16 = vmul.f32 %v1594_v8, %v986_v14 }
0x119e   :  { %v991_v17 = vmul.f32 %v1596_v10, %v987_v15 }
0x1200   :  { %v995_v9 = vpop.permute.xlu0 %994 }
0x1201   :  { %v997_v11 = vpop.permute.xlu1 %996  ;;  %v1000_v12 = vmul.f32 %v1594_v8, %v995_v9 }
0x1202   :  { %v1001_v13 = vmul.f32 %v1596_v10, %v997_v11 }
0x1203   :  { %1004 = vrot.lane.b32.xlu0 %v1000_v12, %s1649_s1 }
0x1204   :  { %1006 = vrot.lane.b32.xlu1 %v1001_v13, %s1649_s1 }
0x1275   :  { %v1005_v18 = vpop.permute.xlu0 %1004 }
0x1276   :  { %v1007_v19 = vpop.permute.xlu1 %1006  ;;  %v1010_v20 = vadd.f32 %v1005_v18, %v990_v16 }
0x1277   :  { %v1011_v21 = vadd.f32 %v1007_v19, %v991_v17 }
0x1278   :  { %1597 = vtanh.f32 %v1010_v20  ;;  %v1126_v52 = vrot.slane %v1010_v20, 7 }
0x1279   :  { %1599 = vtanh.f32 %v1011_v21  ;;  %v1127_v53 = vrot.slane %v1011_v21, 7 }
0x1282   :  { %v1598_v22 = vpop.eup %1597 }
0x1283   :  { %v1600_v23 = vpop.eup %1599  ;;  %1016 = vrot.lane.b32.xlu0 %v1598_v22, %s1648_s0 }
0x1284   :  { %1018 = vrot.lane.b32.xlu1 %v1600_v23, %s1648_s0 }
0x12f5   :  { %v1017_v24 = vpop.permute.xlu0 %1016 }
0x12f6   :  { %v1019_v32 = vpop.permute.xlu1 %1018  ;;  %v1022_v25 = vmul.f32 %v1594_v8, %v1017_v24 }
0x12f7   :  { %v1023_v35 = vmul.f32 %v1596_v10, %v1019_v32 }
0x12f8   :  { %v1026_v26 = vrot.slane %v1022_v25, 6 }
0x12f9   :  { %v1027_v27 = vrot.slane %v1023_v35, 5 }
0x12fb   :  { %v1028_v28 = vsel %vm188_vm3, %v1027_v27, %v1026_v26 }
0x12fc   :  { %1029 = vrot.lane.b32.xlu0 %v1028_v28, %s1649_s1 }
0x136e   :  { %v1030_v29 = vpop.permute.xlu0 %1029 }
0x136f   :  { %1420 = vmatmul.mubr.msk.f32.vlgmr.msra.gmra.mrb[6].mxu1 %vm192_vm4, %v1030_v29 }
0x1442   :  { %v1099_v30 = vpop.f32.mrb[6].mxu1 }
0x1443   :  { %v1104_v33 = vrot.slane %v1099_v30, 1  ;;  %v1105_v36 = vrot.slane %v1099_v30, 2  ;;  %v1421_v37 = vpop.f32.mrb[7].mxu1 }
0x1445   :  { %v1108_v38 = vadd.f32 %v1104_v33, %v1714_v7  ;;  %v1109_v39 = vadd.f32 %v1105_v36, %v1712_v5 }
0x1447   :  { %1601 = vtanh.f32 %v1108_v38  ;;  %v1292_v42 = vmul.f32 -1.442695, %v1108_v38  ;;  %v1293_v43 = vmul.f32 -1.442695, %v1109_v39 }
0x1448   :  { %1603 = vtanh.f32 %v1109_v39 }
0x1449   :  { %1605 = vpow2.f32 %v1292_v42 }
0x144a   :  { %1607 = vpow2.f32 %v1293_v43 }
0x1451   :  { %v1602_v40 = vpop.eup %1601 }
0x1452   :  { %v1604_v41 = vpop.eup %1603  ;;  %1134 = vrot.lane.b32.xlu1 %v1602_v40, %s1648_s0 }
0x1453   :  { %1136 = vrot.lane.b32.xlu0 %v1604_v41, %s1648_s0  ;;  %v1606_v44 = vpop.eup %1605 }
0x1454   :  { %v1608_v45 = vpop.eup %1607  ;;  %v1116_v46 = vadd.f32 1.0, %v1606_v44 }
0x1455   :  { %v1117_v47 = vadd.f32 1.0, %v1608_v45 }
0x1456   :  { %1609 = vrcp.f32 %v1116_v46 }
0x1457   :  { %1611 = vrcp.f32 %v1117_v47 }
0x1460   :  { %v1610_v7 = vpop.eup %1609 }
0x1461   :  { %v1612_v48 = vpop.eup %1611  ;;  %v1130_v54 = vmul.f32 %v1610_v7, %v1126_v52 }
0x1462   :  { %v1131_v55 = vmul.f32 %v1612_v48, %v1127_v53 }
0x14c4   :  { %v1135_v5 = vpop.permute.xlu1 %1134 }
0x14c5   :  { %v1137_v49 = vpop.permute.xlu0 %1136  ;;  %v1140_v50 = vmul.f32 %v1610_v7, %v1135_v5 }
0x14c6   :  { %v1141_v51 = vmul.f32 %v1612_v48, %v1137_v49 }
0x14c7   :  { %1144 = vrot.lane.b32.xlu1 %v1140_v50, %s1649_s1 }
0x14c8   :  { %1146 = vrot.lane.b32.xlu0 %v1141_v51, %s1649_s1 }
0x1539   :  { %v1145_v56 = vpop.permute.xlu1 %1144 }
0x153a   :  { %v1147_v57 = vpop.permute.xlu0 %1146  ;;  %v1150_v58 = vadd.f32 %v1145_v56, %v1130_v54 }
0x153b   :  { %v1151_v59 = vadd.f32 %v1147_v57, %v1131_v55 }
0x153c   :  { %1613 = vtanh.f32 %v1150_v58 }
0x153d   :  { %1615 = vtanh.f32 %v1151_v59 }
0x1546   :  { %v1614_v2 = vpop.eup %1613 }
0x1547   :  { %v1616_v34 = vpop.eup %1615  ;;  %1156 = vrot.lane.b32.xlu1 %v1614_v2, %s1648_s0 }
0x1548   :  { %1158 = vrot.lane.b32.xlu0 %v1616_v34, %s1648_s0 }
0x15b9   :  { %v1157_v3 = vpop.permute.xlu1 %1156 }
0x15ba   :  { %v1159_v4 = vpop.permute.xlu0 %1158  ;;  %v1162_v6 = vmul.f32 %v1610_v7, %v1157_v3 }
0x15bb   :  { %v1163_v8 = vmul.f32 %v1612_v48, %v1159_v4 }
0x15bc   :  { %v1177_v9 = vrot.slane %v1162_v6, 7 }
0x15bd   :  { %v1178_v10 = vrot.slane %v1163_v8, 6 }
0x15bf   :  { %v1179_v11 = vsel %vm188_vm3, %v1178_v10, %v1177_v9 }
0x15c0   :  { %1180 = vrot.lane.b32.xlu1 %v1179_v11, %s1649_s1 }
0x1632   :  { %v1181_v12 = vpop.permute.xlu1 %1180 }
0x1633   :  { %1431 = vmatmul.mubr.msk.f32.vlgmr.msra.gmra.mrb[8].mxu0 %vm192_vm4, %v1181_v12 }
0x1706   :  { %v1250_v13 = vpop.f32.mrb[8].mxu0 }
0x1707   :  { %v1251_v14 = vadd.f32 %v1294_v31, %v1250_v13  ;;  %v1432_v15 = vpop.f32.mrb[9].mxu0 }
0x1709   :  { %v1296_v16 = vmul.f32 -1.442695, %v1251_v14 }
0x170b   :  { %1617 = vpow2.f32 %v1296_v16 }
0x1715   :  { %v1618_v17 = vpop.eup %1617 }
0x1716   :  { %v1257_v18 = vadd.f32 1.0, %v1618_v17 }
0x1718   :  { %1619 = vrcp.f32 %v1257_v18 }
0x1722   :  { %v1620_v19 = vpop.eup %1619 }
0x1723   :  { %1261 = vst.msk [vmem:[%s1888_s6] sm:$0x3] %vm1260_vm5, %v1620_v19 }
0x1724   :  { %1266 = vsyncpa [#allocation3], 1 }

</bundles_post_ra>
